<compile_context>
chip_gen: v7x
topology: tpu7x:2x2x1
jax: 0.10.0
libtpu: 0.0.40
codegen_flags: <defaults>
</compile_context>

<pallas_src>
import functools

import jax
import jax.numpy as jnp
from jax import lax
from jax.experimental import pallas as pl
from jax.experimental.pallas import tpu as pltpu

# Finite stand-in for -inf: exp(-1e30 - m) underflows to exactly 0 for any
# partially-masked row (same result as -inf), but fully-masked rows degrade to
# a uniform distribution instead of torch's NaN.
_MASK_VALUE = -1e30

_DEFAULT_VMEM_CAP = 64 << 20      # v7x physical VMEM; conservative fallback
_Q_TILES = (512, 256, 128)
_K_TILES = (512, 256, 128)


# ----------------------------------------------------------------------------
# Small helpers
# ----------------------------------------------------------------------------
def _vmem_budget_bytes():
    """~85% of this generation's physical VMEM (fallback: v7x's 64 MiB)."""
    try:
        cap = int(pltpu.get_tpu_info().vmem_capacity_bytes)
    except Exception:  # introspection unavailable -> conservative default
        cap = _DEFAULT_VMEM_CAP
    return int(cap * 0.85)


def _inv_softmax_denom(s):
    """1/s via EUP approximate reciprocal + one Newton step (~f32 exact)."""
    inv = pl.reciprocal(s, approx=True)   # EUP slot (otherwise idle)
    return inv * (2.0 - s * inv)


def _maybe_bf16(x, enable):
    return x.astype(jnp.bfloat16) if (enable and x.dtype == jnp.float32) else x


def _as_pred(mask):
    return mask if mask.dtype == jnp.bool_ else (mask != 0)


# ----------------------------------------------------------------------------
# Kernels: attn-returning path (grid = (B, Lq/TQ), K/V resident along qi)
# ----------------------------------------------------------------------------
def _sdpa_body(q, k, v, mask, *, inv_temperature, mxu_bf16):
    q = q * inv_temperature                       # fold temperature into Q
    qm = _maybe_bf16(q, mxu_bf16)
    km = _maybe_bf16(k, mxu_bf16)
    # NT matmul on the MXU: contract the Dk (last) dims directly, no k.T.
    scores = lax.dot_general(
        qm, km, dimension_numbers=(((1,), (1,)), ((), ())),
        preferred_element_type=jnp.float32)                       # (TQ, Lk) f32
    if mask is not None:
        scores = jnp.where(_as_pred(mask), _MASK_VALUE, scores)

    m = jnp.max(scores, axis=-1, keepdims=True)
    e = jnp.exp(scores - m)
    attn = e * _inv_softmax_denom(jnp.sum(e, axis=-1, keepdims=True))

    pv_dtype = jnp.bfloat16 if (mxu_bf16 and v.dtype == jnp.float32) else v.dtype
    out = jnp.dot(attn.astype(pv_dtype), v.astype(pv_dtype),
                  preferred_element_type=jnp.float32)             # (TQ, Dv)
    return out, attn


def _sdpa_kernel(q_ref, k_ref, v_ref, out_ref, attn_ref, *,
                 inv_temperature, mxu_bf16):
    out, attn = _sdpa_body(q_ref[0], k_ref[0], v_ref[0], None,
                           inv_temperature=inv_temperature, mxu_bf16=mxu_bf16)
    out_ref[0] = out.astype(out_ref.dtype)
    attn_ref[0] = attn.astype(attn_ref.dtype)


def _sdpa_masked_kernel(q_ref, k_ref, v_ref, mask_ref, out_ref, attn_ref, *,
                        inv_temperature, mxu_bf16):
    out, attn = _sdpa_body(q_ref[0], k_ref[0], v_ref[0], mask_ref[0],
                           inv_temperature=inv_temperature, mxu_bf16=mxu_bf16)
    out_ref[0] = out.astype(out_ref.dtype)
    attn_ref[0] = attn.astype(attn_ref.dtype)


# ----------------------------------------------------------------------------
# Kernels: flash path (grid = (B, Lq/TQ, Lk/TK), online softmax, no attn out)
# ----------------------------------------------------------------------------
def _flash_body(q, k, v, mask, kj, out_ref, m_sc, l_sc, acc_sc, *,
                inv_temperature, mxu_bf16):
    @pl.when(kj == 0)
    def _():
        m_sc[...] = jnp.full_like(m_sc, -jnp.inf)
        l_sc[...] = jnp.zeros_like(l_sc)
        acc_sc[...] = jnp.zeros_like(acc_sc)

    q = q * inv_temperature
    qm = _maybe_bf16(q, mxu_bf16)
    km = _maybe_bf16(k, mxu_bf16)
    s = lax.dot_general(
        qm, km, dimension_numbers=(((1,), (1,)), ((), ())),
        preferred_element_type=jnp.float32)                       # (TQ, TK) f32
    if mask is not None:
        s = jnp.where(_as_pred(mask), _MASK_VALUE, s)

    m_prev = m_sc[...]
    m_new = jnp.maximum(m_prev, jnp.max(s, axis=-1, keepdims=True))
    alpha = jnp.exp(m_prev - m_new)
    p = jnp.exp(s - m_new)
    l_sc[...] = alpha * l_sc[...] + jnp.sum(p, axis=-1, keepdims=True)

    pv_dtype = jnp.bfloat16 if (mxu_bf16 and v.dtype == jnp.float32) else v.dtype
    acc_sc[...] = alpha * acc_sc[...] + jnp.dot(
        p.astype(pv_dtype), v.astype(pv_dtype),
        preferred_element_type=jnp.float32)
    m_sc[...] = m_new

    @pl.when(kj == pl.num_programs(2) - 1)
    def _():
        l = l_sc[...]
        out_ref[0] = (acc_sc[...] * _inv_softmax_denom(l)).astype(out_ref.dtype)


def _flash_kernel(q_ref, k_ref, v_ref, out_ref, m_sc, l_sc, acc_sc, *,
                  inv_temperature, mxu_bf16):
    _flash_body(q_ref[0], k_ref[0], v_ref[0], None, pl.program_id(2),
                out_ref, m_sc, l_sc, acc_sc,
                inv_temperature=inv_temperature, mxu_bf16=mxu_bf16)


def _flash_masked_kernel(q_ref, k_ref, v_ref, mask_ref, out_ref,
                         m_sc, l_sc, acc_sc, *, inv_temperature, mxu_bf16):
    _flash_body(q_ref[0], k_ref[0], v_ref[0], mask_ref[0], pl.program_id(2),
                out_ref, m_sc, l_sc, acc_sc,
                inv_temperature=inv_temperature, mxu_bf16=mxu_bf16)


# ----------------------------------------------------------------------------
# Tile selection / VMEM estimates
# ----------------------------------------------------------------------------
def _attn_step_bytes(tq, lk, dk, dv, in_it, out_it, attn_it, has_mask):
    blocks = (tq * dk * in_it + lk * dk * in_it + lk * dv * in_it
              + tq * dv * out_it + tq * lk * attn_it
              + (tq * lk if has_mask else 0))        # 1-byte mask tile
    temps = 2 * tq * lk * 4                          # f32 scores + exp
    return 2 * blocks + temps                        # pipeline double-buffers


def _flash_step_bytes(tq, tk, dk, dv, in_it, out_it, has_mask):
    blocks = (tq * dk * in_it + tk * dk * in_it + tk * dv * in_it
              + tq * dv * out_it + (tq * tk if has_mask else 0))
    scratch = (2 * tq + tq * dv) * 4                 # m, l, acc (f32)
    temps = 2 * tq * tk * 4                          # f32 scores + exp
    return 2 * blocks + scratch + temps


def _choose_tile(extent, candidates, fits):
    """Largest candidate <= extent whose VMEM estimate fits; prefer divisors.

    Non-dividing tiles are allowed (the grid uses pl.cdiv and Pallas masks the
    padded tail), so an irregular Lq no longer forces a whole-axis block.
    """
    if extent <= candidates[-1]:
        return extent
    fallback = None
    for t in candidates:
        if t > extent or not fits(t):
            continue
        if extent % t == 0:
            return t
        if fallback is None:
            fallback = t
    return fallback if fallback is not None else min(extent, candidates[-1])


def _choose_k_tile(lk):
    if lk <= _K_TILES[0]:
        return lk
    for t in _K_TILES:
        if lk % t == 0:
            return t
    # TODO(synk): tail-mask the key axis so irregular long Lk can be tiled too.
    return lk


# ----------------------------------------------------------------------------
# Public wrapper
# ----------------------------------------------------------------------------
def scaled_dot_product_attention(q, k, v, temperature, mask=None, *,
                                 return_attn=True, attn_dtype=None,
                                 mxu_bf16=False):
    """Pallas TPU implementation of ScaledDotProductAttention.forward.

    return_attn=True  -> (output, attn)  (module semantics)
    return_attn=False -> output only, flash-style (no attn materialization)
    attn_dtype        -> dtype of the returned attn matrix (default q.dtype)
    mxu_bf16          -> feed f32 matmuls to the MXU in bf16 (f32 accumulate)
    """
    B, Lq, Dk = q.shape
    _, Lk, Dv = v.shape
    assert k.shape == (B, Lk, Dk), k.shape
    assert mask is None or mask.shape == (B, Lq, Lk), None if mask is None else mask.shape

    inv_temperature = 1.0 / float(temperature)
    out_dtype = q.dtype
    attn_dtype = jnp.dtype(out_dtype if attn_dtype is None else attn_dtype)
    in_it = q.dtype.itemsize
    out_it = jnp.dtype(out_dtype).itemsize
    has_mask = mask is not None
    if has_mask and mask.dtype.itemsize != 1:
        # bool / int8 masks stream straight through (no extra HBM round-trip);
        # only wider integer masks get a one-time narrowing.
        mask = mask.astype(jnp.int8)

    budget = _vmem_budget_bytes()

    if return_attn:
        fits = lambda t: _attn_step_bytes(
            t, Lk, Dk, Dv, in_it, out_it, attn_dtype.itemsize, has_mask) <= 0.8 * budget
        tq = _choose_tile(Lq, _Q_TILES, fits)
        grid = (B, pl.cdiv(Lq, tq))

        q_spec = pl.BlockSpec((1, tq, Dk), lambda b, i: (b, i, 0))
        # K/V index maps ignore the query-tile axis -> tiles stay resident
        # across the inner qi sweep of one batch element.
        # (pl.Buffered(1) on these is a possible v7x sweep; default kept here.)
        k_spec = pl.BlockSpec((1, Lk, Dk), lambda b, i: (b, 0, 0))
        v_spec = pl.BlockSpec((1, Lk, Dv), lambda b, i: (b, 0, 0))
        out_specs = (
            pl.BlockSpec((1, tq, Dv), lambda b, i: (b, i, 0)),
            pl.BlockSpec((1, tq, Lk), lambda b, i: (b, i, 0)),
        )
        out_shape = (
            jax.ShapeDtypeStruct((B, Lq, Dv), out_dtype),
            jax.ShapeDtypeStruct((B, Lq, Lk), attn_dtype),
        )
        scratch_shapes = []
        dims = ("parallel", "parallel")
        step_bytes = _attn_step_bytes(tq, Lk, Dk, Dv, in_it, out_it,
                                      attn_dtype.itemsize, has_mask)
        if has_mask:
            kernel = functools.partial(_sdpa_masked_kernel,
                                       inv_temperature=inv_temperature,
                                       mxu_bf16=mxu_bf16)
            in_specs = [q_spec, k_spec, v_spec,
                        pl.BlockSpec((1, tq, Lk), lambda b, i: (b, i, 0))]
            operands = (q, k, v, mask)
        else:
            kernel = functools.partial(_sdpa_kernel,
                                       inv_temperature=inv_temperature,
                                       mxu_bf16=mxu_bf16)
            in_specs = [q_spec, k_spec, v_spec]
            operands = (q, k, v)
    else:
        # Flash-style: tile the key axis, online softmax, no attn writeback.
        tk = _choose_k_tile(Lk)
        fits = lambda t: _flash_step_bytes(
            t, tk, Dk, Dv, in_it, out_it, has_mask) <= 0.8 * budget
        tq = _choose_tile(Lq, _Q_TILES, fits)
        grid = (B, pl.cdiv(Lq, tq), pl.cdiv(Lk, tk))

        q_spec = pl.BlockSpec((1, tq, Dk), lambda b, i, j: (b, i, 0))
        k_spec = pl.BlockSpec((1, tk, Dk), lambda b, i, j: (b, j, 0))
        v_spec = pl.BlockSpec((1, tk, Dv), lambda b, i, j: (b, j, 0))
        out_specs = pl.BlockSpec((1, tq, Dv), lambda b, i, j: (b, i, 0))
        out_shape = jax.ShapeDtypeStruct((B, Lq, Dv), out_dtype)
        scratch_shapes = [pltpu.VMEM((tq, 1), jnp.float32),   # running max
                          pltpu.VMEM((tq, 1), jnp.float32),   # running denom
                          pltpu.VMEM((tq, Dv), jnp.float32)]  # accumulator
        dims = ("parallel", "parallel", "arbitrary")
        step_bytes = _flash_step_bytes(tq, tk, Dk, Dv, in_it, out_it, has_mask)
        if has_mask:
            kernel = functools.partial(_flash_masked_kernel,
                                       inv_temperature=inv_temperature,
                                       mxu_bf16=mxu_bf16)
            in_specs = [q_spec, k_spec, v_spec,
                        pl.BlockSpec((1, tq, tk), lambda b, i, j: (b, i, j))]
            operands = (q, k, v, mask)
        else:
            kernel = functools.partial(_flash_kernel,
                                       inv_temperature=inv_temperature,
                                       mxu_bf16=mxu_bf16)
            in_specs = [q_spec, k_spec, v_spec]
            operands = (q, k, v)

    # Generation-aware scoped-VMEM limit: what this step needs plus headroom,
    # capped at ~85% of physical capacity (keeps Mosaic internal scratch room
    # on v7x, and stops throwing away half of the 128 MiB on v5e/v6e).
    vmem_limit = int(min(budget, max(step_bytes + (8 << 20), 32 << 20)))

    compiler_params = pltpu.CompilerParams(
        dimension_semantics=dims,
        vmem_limit_bytes=vmem_limit,
    )

    return pl.pallas_call(
        kernel,
        out_shape=out_shape,
        grid_spec=pltpu.PrefetchScalarGridSpec(
            num_scalar_prefetch=0,
            grid=grid,
            in_specs=in_specs,
            out_specs=out_specs,
            scratch_shapes=scratch_shapes,
        ),
        compiler_params=compiler_params,
    )(*operands)


# ----------------------------------------------------------------------------
# Pure-JAX reference of the PyTorch module + self-test
# ----------------------------------------------------------------------------
def _reference(q, k, v, temperature, mask=None):
    attn = jnp.einsum("bqd,bkd->bqk", q, k) / float(temperature)
    if mask is not None:
        attn = jnp.where(mask, -jnp.inf, attn)
    attn = jax.nn.softmax(attn, axis=-1)
    out = jnp.einsum("bqk,bkd->bqd", attn, v)
    return out, attn


def _check(got, ref, name, atol, rtol):
    got = jnp.asarray(got, jnp.float32)
    ref = jnp.asarray(ref, jnp.float32)
    assert jnp.allclose(got, ref, atol=atol, rtol=rtol), (
        f"{name} mismatch: max abs diff = {float(jnp.max(jnp.abs(got - ref)))}")


if __name__ == "__main__":
    key = jax.random.PRNGKey(0)
    kq, kk, kv, km = jax.random.split(key, 4)

    ATTN_TOL = dict(atol=2e-5, rtol=2e-5)
    OUT_TOL = dict(atol=2e-3, rtol=2e-3)
    BF16_ATTN_TOL = dict(atol=5e-3, rtol=5e-3)
    BF16_MXU_TOL = dict(atol=1e-1, rtol=1e-1)

    # 1) small shape, mask=None (PyTorch default), attn-returning path.
    B, Lq, Lk, Dk, Dv = 2, 8, 8, 32, 32
    temperature = float(Dk) ** 0.5
    q = jax.random.normal(kq, (B, Lq, Dk), dtype=jnp.float32)
    k = jax.random.normal(kk, (B, Lk, Dk), dtype=jnp.float32)
    v = jax.random.normal(kv, (B, Lk, Dv), dtype=jnp.float32)
    out, attn = scaled_dot_product_attention(q, k, v, temperature)
    jax.block_until_ready((out, attn))
    out_r, attn_r = _reference(q, k, v, temperature)
    _check(attn, attn_r, "attn", **ATTN_TOL)
    _check(out, out_r, "output", **OUT_TOL)

    # 2) masked path (bool mask passed straight through, no wrapper astype).
    mask = jax.random.bernoulli(km, p=0.25, shape=(B, Lq, Lk))
    mask = mask.at[:, :, 0].set(False)   # keep every softmax row well defined
    out_m, attn_m = scaled_dot_product_attention(q, k, v, temperature, mask=mask)
    jax.block_until_ready((out_m, attn_m))
    out_mr, attn_mr = _reference(q, k, v, temperature, mask=mask)
    _check(attn_m, attn_mr, "masked attn", **ATTN_TOL)
    _check(out_m, out_mr, "masked output", **OUT_TOL)

    # 3) tiled attn path: Lq=256 now picks TQ=256 (lq >= t fix), resident K/V.
    B2, Lq2, Lk2, Dk2, Dv2 = 2, 256, 128, 64, 64
    k2q, k2k, k2v, k2m = jax.random.split(jax.random.PRNGKey(1), 4)
    q2 = jax.random.normal(k2q, (B2, Lq2, Dk2), dtype=jnp.float32)
    k2 = jax.random.normal(k2k, (B2, Lk2, Dk2), dtype=jnp.float32)
    v2 = jax.random.normal(k2v, (B2, Lk2, Dv2), dtype=jnp.float32)
    m2 = jax.random.bernoulli(k2m, p=0.25, shape=(B2, Lq2, Lk2))
    m2 = m2.at[:, :, 0].set(False)
    t2 = float(Dk2) ** 0.5
    out2, attn2 = scaled_dot_product_attention(q2, k2, v2, t2, mask=m2)
    jax.block_until_ready((out2, attn2))
    out2_r, attn2_r = _reference(q2, k2, v2, t2, mask=m2)
    _check(attn2, attn2_r, "tiled attn", **ATTN_TOL)
    _check(out2, out2_r, "tiled output", **OUT_TOL)

    # 3b) bf16 attn writeback (halves the dominant HBM write stream).
    out2b, attn2b = scaled_dot_product_attention(q2, k2, v2, t2, mask=m2,
                                                 attn_dtype=jnp.bfloat16)
    jax.block_until_ready((out2b, attn2b))
    _check(attn2b, attn2_r, "bf16 attn", **BF16_ATTN_TOL)
    _check(out2b, out2_r, "bf16-attn output", **OUT_TOL)

    # 4) flash path (return_attn=False): key axis tiled (Lk=1024 -> TK=512,
    #    two online-softmax blocks), no attention matrix materialized.
    B3, Lq3, Lk3, Dk3, Dv3 = 2, 256, 1024, 64, 64
    k3q, k3k, k3v, k3m = jax.random.split(jax.random.PRNGKey(2), 4)
    q3 = jax.random.normal(k3q, (B3, Lq3, Dk3), dtype=jnp.float32)
    k3 = jax.random.normal(k3k, (B3, Lk3, Dk3), dtype=jnp.float32)
    v3 = jax.random.normal(k3v, (B3, Lk3, Dv3), dtype=jnp.float32)
    m3 = jax.random.bernoulli(k3m, p=0.25, shape=(B3, Lq3, Lk3))
    m3 = m3.at[:, :, 0].set(False)
    t3 = float(Dk3) ** 0.5
    out3 = scaled_dot_product_attention(q3, k3, v3, t3, mask=m3,
                                        return_attn=False)
    jax.block_until_ready(out3)
    out3_r, _ = _reference(q3, k3, v3, t3, mask=m3)
    _check(out3, out3_r, "flash output", **OUT_TOL)

    # 5) flash path + bf16 MXU feeding (opt-in; loose smoke check).
    out3b = scaled_dot_product_attention(q3, k3, v3, t3, mask=m3,
                                         return_attn=False, mxu_bf16=True)
    jax.block_until_ready(out3b)
    _check(out3b, out3_r, "flash bf16-mxu output", **BF16_MXU_TOL)

    print("KERNEL_OK")
</pallas_src>

<mosaic_0001>
module attributes {stable_mosaic.version = 11 : i64} {
  func.func @_sdpa_kernel(%arg0: i32, %arg1: i32, %arg2: memref<1x8x32xf32, #tpu.memory_space<vmem>>, %arg3: memref<1x8x32xf32, #tpu.memory_space<vmem>>, %arg4: memref<1x8x32xf32, #tpu.memory_space<vmem>>, %arg5: memref<1x8x32xf32, #tpu.memory_space<vmem>>, %arg6: memref<1x8x8xf32, #tpu.memory_space<vmem>>) attributes {dimension_semantics = [#tpu.dimension_semantics<parallel>, #tpu.dimension_semantics<parallel>], iteration_bounds = array<i64: 2, 1>, scalar_prefetch = 0 : i64, scratch_operands = 0 : i64, tpu.core_type = #tpu.core_type<tc>, window_params = [{transform_indices = @transform_0, window_bounds = array<i64: 1, 8, 32>}, {transform_indices = @transform_1, window_bounds = array<i64: 1, 8, 32>}, {transform_indices = @transform_2, window_bounds = array<i64: 1, 8, 32>}, {transform_indices = @transform_3, window_bounds = array<i64: 1, 8, 32>}, {transform_indices = @transform_4, window_bounds = array<i64: 1, 8, 8>}]} {
    %c0 = arith.constant 0 : index
    %c0_0 = arith.constant 0 : index
    %c0_1 = arith.constant 0 : index
    %0 = vector.load %arg2[%c0, %c0_0, %c0_1] : memref<1x8x32xf32, #tpu.memory_space<vmem>>, vector<1x8x32xf32>
    %1 = vector.shape_cast %0 : vector<1x8x32xf32> to vector<8x32xf32>
    %c0_2 = arith.constant 0 : index
    %c0_3 = arith.constant 0 : index
    %c0_4 = arith.constant 0 : index
    %2 = vector.load %arg3[%c0_2, %c0_3, %c0_4] : memref<1x8x32xf32, #tpu.memory_space<vmem>>, vector<1x8x32xf32>
    %3 = vector.shape_cast %2 : vector<1x8x32xf32> to vector<8x32xf32>
    %c0_5 = arith.constant 0 : index
    %c0_6 = arith.constant 0 : index
    %c0_7 = arith.constant 0 : index
    %4 = vector.load %arg4[%c0_5, %c0_6, %c0_7] : memref<1x8x32xf32, #tpu.memory_space<vmem>>, vector<1x8x32xf32>
    %5 = vector.shape_cast %4 : vector<1x8x32xf32> to vector<8x32xf32>
    %cst = arith.constant 0.176776692 : f32
    %6 = vector.broadcast %cst : f32 to vector<8x32xf32>
    %7 = arith.mulf %1, %6 : vector<8x32xf32>
    %cst_8 = arith.constant dense<0.000000e+00> : vector<8x8xf32>
    %8 = tpu.matmul %7, %3, %cst_8 {dimension_numbers = #tpu.dot_dimension_numbers<[1], [1], [0], [0], [0, 0, 1, 0], [], []>} : vector<8x32xf32>, vector<8x32xf32>, vector<8x8xf32> -> vector<8x8xf32>
    %cst_9 = arith.constant dense<0xFF800000> : vector<8xf32>
    %9 = vector.multi_reduction <maximumf>, %8, %cst_9 [1] : vector<8x8xf32> to vector<8xf32>
    %10 = vector.shape_cast %9 : vector<8xf32> to vector<8x1xf32>
    %11 = vector.broadcast %10 : vector<8x1xf32> to vector<8x8xf32>
    %12 = arith.subf %8, %11 : vector<8x8xf32>
    %13 = math.exp %12 : vector<8x8xf32>
    %cst_10 = arith.constant dense<0.000000e+00> : vector<8xf32>
    %14 = vector.multi_reduction <add>, %13, %cst_10 [1] : vector<8x8xf32> to vector<8xf32>
    %15 = vector.shape_cast %14 : vector<8xf32> to vector<8x1xf32>
    %16 = tpu.reciprocal %15 {approx = true} : vector<8x1xf32> -> vector<8x1xf32>
    %17 = arith.mulf %15, %16 : vector<8x1xf32>
    %cst_11 = arith.constant 2.000000e+00 : f32
    %18 = vector.broadcast %cst_11 : f32 to vector<8x1xf32>
    %19 = arith.subf %18, %17 : vector<8x1xf32>
    %20 = arith.mulf %16, %19 : vector<8x1xf32>
    %21 = vector.broadcast %20 : vector<8x1xf32> to vector<8x8xf32>
    %22 = arith.mulf %13, %21 : vector<8x8xf32>
    %cst_12 = arith.constant dense<0.000000e+00> : vector<8x32xf32>
    %23 = tpu.matmul %22, %5, %cst_12 {dimension_numbers = #tpu.dot_dimension_numbers<[1], [0], [0], [1], [0, 0, 1, 1], [], []>} : vector<8x8xf32>, vector<8x32xf32>, vector<8x32xf32> -> vector<8x32xf32>
    %c0_13 = arith.constant 0 : index
    %c0_14 = arith.constant 0 : index
    %c0_15 = arith.constant 0 : index
    %24 = vector.load %arg5[%c0_13, %c0_14, %c0_15] : memref<1x8x32xf32, #tpu.memory_space<vmem>>, vector<1x8x32xf32>
    %25 = vector.shape_cast %24 : vector<1x8x32xf32> to vector<8x32xf32>
    %26 = vector.shape_cast %23 : vector<8x32xf32> to vector<1x8x32xf32>
    tpu.vector_store %arg5[%c0_13, %c0_14, %c0_15], %26 {strides = array<i32>} : memref<1x8x32xf32, #tpu.memory_space<vmem>>, vector<1x8x32xf32>,
    %c0_16 = arith.constant 0 : index
    %c0_17 = arith.constant 0 : index
    %c0_18 = arith.constant 0 : index
    %27 = vector.load %arg6[%c0_16, %c0_17, %c0_18] : memref<1x8x8xf32, #tpu.memory_space<vmem>>, vector<1x8x8xf32>
    %28 = vector.shape_cast %27 : vector<1x8x8xf32> to vector<8x8xf32>
    %29 = vector.shape_cast %22 : vector<8x8xf32> to vector<1x8x8xf32>
    tpu.vector_store %arg6[%c0_16, %c0_17, %c0_18], %29 {strides = array<i32>} : memref<1x8x8xf32, #tpu.memory_space<vmem>>, vector<1x8x8xf32>,
    return
  }
  func.func @transform_0(%arg0: i32, %arg1: i32) -> (i32, i32, i32) {
    %c0_i32 = arith.constant 0 : i32
    %c0_i32_0 = arith.constant 0 : i32
    return %arg0, %arg1, %c0_i32 : i32, i32, i32
  }
  func.func @transform_1(%arg0: i32, %arg1: i32) -> (i32, i32, i32) {
    %c0_i32 = arith.constant 0 : i32
    %c0_i32_0 = arith.constant 0 : i32
    %c0_i32_1 = arith.constant 0 : i32
    return %arg0, %c0_i32, %c0_i32_0 : i32, i32, i32
  }
  func.func @transform_2(%arg0: i32, %arg1: i32) -> (i32, i32, i32) {
    %c0_i32 = arith.constant 0 : i32
    %c0_i32_0 = arith.constant 0 : i32
    %c0_i32_1 = arith.constant 0 : i32
    return %arg0, %c0_i32, %c0_i32_0 : i32, i32, i32
  }
  func.func @transform_3(%arg0: i32, %arg1: i32) -> (i32, i32, i32) {
    %c0_i32 = arith.constant 0 : i32
    %c0_i32_0 = arith.constant 0 : i32
    return %arg0, %arg1, %c0_i32 : i32, i32, i32
  }
  func.func @transform_4(%arg0: i32, %arg1: i32) -> (i32, i32, i32) {
    %c0_i32 = arith.constant 0 : i32
    %c0_i32_0 = arith.constant 0 : i32
    return %arg0, %arg1, %c0_i32 : i32, i32, i32
  }
}

</mosaic_0001>

<bundles_post_ra>
// kernel: tpu_custom_call.1
= control target key start
LH: loop header
LB: loop body
LE: loop exit
PB: predicated region body
PF: predicated region fallthrough
CT: control target
= control target key end

     0   :  { %s1338_s0 = inlined_call_operand.hbm [shape: f32[2,8,32], index: 0, kind: input, shape index: {}]   ;;  %s1339_s1 = inlined_call_operand.hbm [shape: f32[2,8,32], index: 1, kind: input, shape index: {}]   ;;  %s1340_s2 = inlined_call_operand.hbm [shape: f32[2,8,32], index: 2, kind: input, shape index: {}]   ;;  %s1341_s3 = inlined_call_operand.hbm [shape: f32[2,8,32], index: 3, kind: output, shape index: {0}]   ;;  %s1342_s4 = inlined_call_operand.hbm [shape: f32[2,8,8], index: 4, kind: output, shape index: {1}]  }
   0x1   :  { %1351 = sst [smem:[#allocation19_spill]] %s1339_s1 }
   0x2   :  { %10 = vsyncpa [#allocation3], 0 }
   0x3   :  { %12 = vsyncpa [#allocation3 + $0x1], 0 }
   0x4   :  { %13 = vsyncpa [#allocation6], 0 }
   0x5   :  { %15 = vsyncpa [#allocation6 + $0x1], 0 }
   0x6   :  { %16 = vsyncpa [#allocation4], 0 }
   0x7   :  { %18 = vsyncpa [#allocation4 + $0x1], 0 }
   0x8   :  { %19 = vsyncpa [#allocation10], 0 }
   0x9   :  { %21 = vsyncpa [#allocation10 + $0x1], 0  ;;  %s1039_s15 = smov 0   ;;  %s1041_s16 = smov 0  }
   0xa   :  { %s1043_s17 = smov 0   ;;  %s1045_s18 = smov 0  }
   0xb   :  { %s1047_s19 = smov 0   ;;  %s1049_s20 = smov 0  }
   0xc LB: > { %1352 = sst [smem:[#allocation15_spill]] %s1001_s19  ;;  %s1070_s21 = sadd.s32 4294967295, %s1005_s20   ;;  %s1005_s20 = sphi %s1049_s20, %s27_s20   ;;  %s1001_s19 = sphi %s1047_s19, %s1376_s19   ;;  %s997_s18 = sphi %s1045_s18, %s1375_s18   ;;  %s993_s17 = sphi %s1043_s17, %s1379_s17   ;;  %s989_s16 = sphi %s1041_s16, %s1378_s16   ;;  %s985_s15 = sphi %s1039_s15, %s1377_s15  }
   0xd   : > { %1353 = sst [smem:[#allocation16_spill]] %s1005_s20  ;;  %s676_s22 = sadd.s32 4294967294, %s1005_s20  }
   0xe   : > { %s39_s23 = sadd.s32 1, %s1001_s19  ;;  %s48_s24 = sadd.s32 1, %s993_s17 }
   0xf   : > { %p41_p0 = scmp.ge.s32.totalorder %s39_s23, 2  ;;  %p55_p1 = scmp.ne.s32.totalorder %s993_s17, %s989_s16 }
  0x10   : > { %p56_p2 = scmp.eq.s32.totalorder %s1005_s20, 0  ;;  %p61_p3 = scmp.ne.s32.totalorder %s989_s16, %s985_s15 }
  0x11   : > { %s1381_s23 = smov (%p41_p0, %s39_s23), 0  ;;  %p62_p5 = scmp.eq.s32.totalorder %s1070_s21, 0 }
  0x12   : > { %1354 = sst [smem:[#allocation17_spill]] %s1381_s23  ;;  %p1082_p4 = por %p56_p2, %p55_p1 }
  0x13   : > { %s43_s26 = ssub.s32 %s1001_s19, %s1381_s23  ;;  %p139_p6 = scmp.eq.s32.totalorder %s1070_s21, 1 }
  0x14   : > { %p46_p7 = scmp.eq.s32.totalorder %s43_s26, 0  ;;  %p1090_p8 = por %p62_p5, %p61_p3 }
  0x15   : > { %p1094_p9 = por %p139_p6, %p55_p1  ;;  %p145_p10 = scmp.eq.s32.totalorder %s676_s22, 1 }
  0x16   : > { %s1356_s27 = scalar_select %p1090_p8, 1, 0 }
  0x17   : > { %s1357_s28 = scalar_select %p1094_p9, 1, 0 }
  0x18   : > { %s1099_s29 = scalar_select %p46_p7, %s993_s17, %s48_s24  }
  0x19   : > { %p1101_p11 = por %p145_p10, %p61_p3  ;;  %p741_p13 = scmp.lt.s32.totalorder %s1005_s20, 2 }
  0x1a   : > { %1358 = sst [smem:[#allocation18_spill]] %s1099_s29  ;;  %s1343_s5 = sand.u32 1, %s993_s17  }
  0x1b   : > { %s1359_s30 = scalar_select %p1101_p11, 1, 0 }
  0x1c   : > { %s1110_s6 = sshll.u32 %s1343_s5, 3  ;;  %s1113_s7 = sshll.u32 %s1001_s19, 7 }
  0x1d   : > { %p1117_p0 = pnand %p741_p13, %p1082_p4  ;;  %s212_s9 = sand.u32 1, %s1005_s20  }
  0x1e   : > { %s1361_s1 = sld [smem:[#allocation19_spill]]  ;;  %s216_s13 = scalar_lea.vmem [#allocation5], %s1110_s6 }
  0x1f   : > { %s1360_s8 = scalar_select %p1117_p0, 1, 0 }
  0x20   : > { %s223_s14 = sshll.u32 %s216_s13, 4  ;;  %s1133_s22 = scalar_lea.sflag [#allocation6], %s212_s9  ;;  %s1130_s14 = int_to_ptr.vmem [resolvable:$true] %s223_s14 }
  0x21   : > { %p1139_p4 = pneg %p1117_p0 }
  0x24   : > { %s1126_s12 = scalar_lea.hbm %s1361_s1, %s1113_s7  ;;  %s802_s11 = scalar_lea.hbm %s1361_s1, 256 }
  0x25   : > { %s797_s24 = scalar_lea.hbm %s1126_s12, 128  ;;  %p803_p7 = scmp.lt.u32.totalorder %s1126_s12, %s1361_s1 }
  0x26   : > { %p798_p3 = scmp.ne.s32.totalorder %s1126_s12, %s797_s24  ;;  %p804_p10 = scmp.lt.u32.totalorder %s802_s11, %s797_s24 }
  0x27   : > { %p806_p12 = scmp.lt.u32.totalorder %s797_s24, %s1126_s12 }
  0x28   : > { %p800_p5 = pnand %p1139_p4, %p798_p3  ;;  %p805_p13 = por %p804_p10, %p803_p7 }
  0x2a   : > { %p801_p6 = pneg %p800_p5  ;;  %p807_p1 = por %p806_p12, %p805_p13 }
  0x2c   : > { %p808_p2 = pnand %p807_p1, %p801_p6 }
  0x2e   : > { %811 = shalt.err (!%p808_p2)
}
  0x2f   : > { %s812_s9 = scalar_lea.vmem %s1130_s14, 128  ;;  %s1007_s26 = smov [#allocation5]  }
  0x30   : > { %p813_p3 = scmp.ne.s32.totalorder %s1130_s14, %s812_s9  ;;  %s817_s10 = sshll.u32 %s1007_s26, 4  ;;  %s818_s10 = int_to_ptr.vmem [resolvable:$false] %s817_s10 }
  0x31   : > { %s819_s5 = scalar_lea.vmem %s818_s10, 256  ;;  %p820_p9 = scmp.lt.s32.totalorder %s1130_s14, %s818_s10 }
  0x32   : > { %p815_p5 = pnand %p813_p3, %p1139_p4  ;;  %p821_p8 = scmp.lt.s32.totalorder %s819_s5, %s812_s9 }
  0x34   : > { %p816_p11 = pneg %p815_p5  ;;  %p822_p7 = por %p821_p8, %p820_p9 }
  0x36   : > { %p823_p10 = pnand %p822_p7, %p816_p11 }
  0x38   : > { %826 = shalt.err (!%p823_p10)
}
  0x39   : > { %730 = dma.hbm_to_vmem [thread:$0]  (!%p1117_p0), %s1126_s12, 128, %s1130_s14, %s1133_s22  }
  0x3a   : > { %p1363_p12 = scmp.lt.s32.totalorder %s1005_s20, 3  ;;  %p1364_p1 = scmp.ge.s32.totalorder %s1005_s20, 1 }
  0x3b   : > { %s1175_s9 = scalar_lea.hbm %s1338_s0, %s1113_s7  ;;  %s197_s26 = scalar_lea.vmem [#allocation2], %s1110_s6 }
  0x3c   : > { %p1167_p2 = pnand %p1364_p1, %p1363_p12  ;;  %s205_s10 = sshll.u32 %s197_s26, 4  ;;  %s1178_s10 = int_to_ptr.vmem [resolvable:$true] %s205_s10 }
  0x3d   : > { %s1184_s5 = scalar_lea.hbm %s1340_s2, %s1113_s7  ;;  %s1366_s1 = sand.u32 1, %s993_s17  }
  0x3e   : > { %s1365_s24 = scalar_select %p1167_p2, 1, 0 }
  0x3f   : > { %s194_s23 = scalar_lea.sflag [#allocation3], %s1366_s1  ;;  %s827_s19 = scalar_lea.hbm %s1175_s9, 128 }
  0x40   : > { %p828_p8 = scmp.ne.s32.totalorder %s1175_s9, %s827_s19  ;;  %s832_s29 = scalar_lea.hbm %s1338_s0, 256 }
  0x41   : > { %p833_p6 = scmp.lt.u32.totalorder %s1175_s9, %s1338_s0  ;;  %p834_p13 = scmp.lt.u32.totalorder %s832_s29, %s827_s19 }
  0x42   : > { %p830_p9 = pnand %p828_p8, %p1139_p4  ;;  %p836_p5 = scmp.lt.u32.totalorder %s827_s19, %s1175_s9 }
  0x43   : > { %p835_p3 = por %p834_p13, %p833_p6 }
  0x44   : > { %p831_p11 = pneg %p830_p9 }
  0x45   : > { %p837_p7 = por %p836_p5, %p835_p3 }
  0x47   : > { %p838_p10 = pnand %p837_p7, %p831_p11 }
  0x49   : > { %841 = shalt.err (!%p838_p10)
}
  0x4a   : > { %s842_s1 = scalar_lea.vmem %s1178_s10, 128  ;;  %s1008_s7 = smov [#allocation2]  }
  0x4b   : > { %p843_p12 = scmp.ne.s32.totalorder %s1178_s10, %s842_s1  ;;  %s847_s12 = sshll.u32 %s1008_s7, 4  ;;  %s848_s12 = int_to_ptr.vmem [resolvable:$false] %s847_s12 }
  0x4c   : > { %s849_s20 = scalar_lea.vmem %s848_s12, 256  ;;  %p850_p9 = scmp.lt.s32.totalorder %s1178_s10, %s848_s12 }
  0x4d   : > { %p845_p1 = pnand %p843_p12, %p1139_p4  ;;  %p851_p2 = scmp.lt.s32.totalorder %s849_s20, %s842_s1 }
  0x4f   : > { %p846_p8 = pneg %p845_p1  ;;  %p852_p6 = por %p851_p2, %p850_p9 }
  0x51   : > { %p853_p13 = pnand %p852_p6, %p846_p8 }
  0x53   : > { %856 = shalt.err (!%p853_p13)
}
  0x54   : > { %727 = dma.hbm_to_vmem [thread:$0]  (!%p1117_p0), %s1175_s9, 128, %s1178_s10, %s194_s23  }
  0x55   : > { %s234_s19 = scalar_lea.vmem [#allocation7], %s1110_s6  ;;  %s857_s14 = scalar_lea.hbm %s1184_s5, 128 }
  0x56   : > { %s241_s29 = sshll.u32 %s234_s19, 4  ;;  %p858_p11 = scmp.ne.s32.totalorder %s1184_s5, %s857_s14  ;;  %s242_s29 = int_to_ptr.vmem [resolvable:$true] %s241_s29 }
  0x57   : > { %s862_s26 = scalar_lea.hbm %s1340_s2, 256  ;;  %p863_p5 = scmp.lt.u32.totalorder %s1184_s5, %s1340_s2 }
  0x58   : > { %p860_p2 = pnand %p858_p11, %p1139_p4  ;;  %p864_p7 = scmp.lt.u32.totalorder %s862_s26, %s857_s14 }
  0x59   : > { %p866_p12 = scmp.lt.u32.totalorder %s857_s14, %s1184_s5 }
  0x5a   : > { %p861_p3 = pneg %p860_p2  ;;  %p865_p10 = por %p864_p7, %p863_p5 }
  0x5c   : > { %p867_p1 = por %p866_p12, %p865_p10 }
  0x5e   : > { %p868_p8 = pnand %p867_p1, %p861_p3 }
  0x60   : > { %871 = shalt.err (!%p868_p8)
}
  0x61   : > { %s872_s23 = scalar_lea.vmem %s242_s29, 128  ;;  %s1009_s6 = smov [#allocation7]  }
  0x62   : > { %p873_p9 = scmp.ne.s32.totalorder %s242_s29, %s872_s23  ;;  %s877_s9 = sshll.u32 %s1009_s6, 4  ;;  %s878_s9 = int_to_ptr.vmem [resolvable:$false] %s877_s9 }
  0x63   : > { %s879_s10 = scalar_lea.vmem %s878_s9, 256  ;;  %p880_p11 = scmp.lt.s32.totalorder %s242_s29, %s878_s9 }
  0x64   : > { %p875_p6 = pnand %p873_p9, %p1139_p4  ;;  %p881_p2 = scmp.lt.s32.totalorder %s879_s10, %s872_s23 }
  0x66   : > { %p876_p13 = pneg %p875_p6  ;;  %p882_p0 = por %p881_p2, %p880_p11 }
  0x68   : > { %p883_p5 = pnand %p882_p0, %p876_p13 }
  0x6a   : > { %886 = shalt.err (!%p883_p5)
}
  0x6b   : > { %p1367_p7 = scmp.ne.s32.totalorder %s1360_s8, 0  ;;  %p1368_p3 = scmp.ne.s32.totalorder %s1365_s24, 0 }
  0x6c   : > { %s1231_s25 = sand.u32 (!%p1368_p3), 1, %s989_s16   ;;  %p1369_p0 = scmp.ne.s32.totalorder (!%p1368_p3), %s1356_s27, 0 }
  0x6d   : > { %733 = dma.hbm_to_vmem [thread:$0]  (!%p1367_p7), %s1184_s5, 128, %s242_s29, %s1133_s22  }
  0x6e   : > { %250 = sbr.rel (%p1368_p3) target bundleno = 885 (0x375), region = 32  ;;  %s1234_s12 = sshll.u32 (!%p1368_p3), %s1231_s25, 3 }
  0x6f   : > { %s253_s20 = scalar_lea.sflag (!%p1368_p3), [#allocation3], %s1231_s25  ;;  %s256_s19 = scalar_lea.vmem (!%p1368_p3), [#allocation2], %s1234_s12 }
  0x75   : > { %968 = dma.done.wait (%p1369_p0), %s253_s20, 128  }
  0x76   : > { %970 = vsyncadd (%p1369_p0), %s253_s20, 4294967168  ;;  %s261_s8 = sand.u32 1, %s1070_s21   ;;  %s265_s24 = scalar_lea.vmem [#allocation5], %s1234_s12 }
  0x77   : > { %s262_s22 = scalar_lea.sflag [#allocation6], %s261_s8 }
  0x78   : > { %972 = dma.done.wait (%p1369_p0), %s262_s22, 256  }
  0x79   : > { %974 = vsyncadd (%p1369_p0), %s262_s22, 4294967040  ;;  %v1010_v0 = vmov 0.0   ;;  %vm1011_vm0 = vmmov 0   ;;  %vm318_vm1 = vcmask 261120   ;;  %v315_v1 = vld [vmem:[%s265_s24] sm:$0xff]  ;;  %v314_v2 = vld [vmem:[%s256_s19] sm:$0xff] }
  0x7a   : > { %704 = vmatprep.subr.mxu0 %v1010_v0  ;;  %706 = vmatprep.mubr.msk.f32.mxu0 %vm1011_vm0, %v1010_v0  ;;  %v317_v3 = vmul.f32 0.17677669, %v314_v2  ;;  %vm395_vm2 = vcmask 64512   ;;  %s274_s21 = scalar_lea.vmem [#allocation7], %s1234_s12  ;;  %s313_s27 = scalar_lea.vmem [#allocation9], %s1234_s12 }
  0x7b   : > { %709 = vmatprep.subr.mxu1 %v1010_v0  ;;  %711 = vmatprep.mubr.msk.f32.mxu1 %vm1011_vm0, %v1010_v0  ;;  %v316_v12 = vld [vmem:[%s274_s21] sm:$0xff]  ;;  %s696_s5 = sshll.u32 %s997_s18, 7  ;;  %s519_s13 = sshll.u32 %s313_s27, 4  ;;  %s520_s13 = int_to_ptr.vmem [resolvable:$true] %s519_s13 }
  0x7c   : > { %705 = vmatpush3.xpose.msk.msra.mxu0 %vm318_vm1, %v315_v1  ;;  %710 = vmatpush3.msra.mxu1 %v316_v12  ;;  %s1262_s11 = scalar_lea.hbm %s1342_s4, %s696_s5  ;;  %s491_s26 = scalar_lea.sflag [#allocation10], %s1231_s25 }
  0x7d   : > { %s887_s1 = scalar_lea.vmem %s520_s13, 128  ;;  %p1370_p10 = scmp.ne.s32.totalorder %s1357_s28, 0 }
  0x7e   : > { %p888_p4 = scmp.ne.s32.totalorder %s520_s13, %s887_s1  ;;  %s1012_s7 = smov [#allocation9]  }
  0x7f   : > { %707 = vmatmul.mubr.msk.f32.vlgmr.msra.gmra.mrb[0].mxu0 %vm318_vm1, %v317_v3  ;;  %s891_s23 = sshll.u32 %s1012_s7, 4  ;;  %s892_s23 = int_to_ptr.vmem [resolvable:$false] %s891_s23 }
  0x80   : > { %p889_p12 = pnand %p888_p4, %p1370_p10  ;;  %s893_s6 = scalar_lea.vmem %s892_s23, 256 }
  0x81   : > { %p894_p8 = scmp.lt.s32.totalorder %s520_s13, %s892_s23  ;;  %p895_p9 = scmp.lt.s32.totalorder %s893_s6, %s887_s1 }
  0x82   : > { %p890_p1 = pneg %p889_p12 }
  0x83   : > { %p896_p6 = por %p895_p9, %p894_p8 }
  0x85   : > { %p897_p13 = pnand %p896_p6, %p890_p1 }
 0x152   : > { %v391_v4 = vpop.f32.mrb[0].mxu0 }
 0x153   : > { %v708_v5 = vpop.f32.mrb[1].mxu0  ;;  %v396_v6 = vsel %vm395_vm2, %v391_v4, -inf }
 0x154   : > { %397 = vmax.xlane.f32.xlu0 %v396_v6 }
 0x1e1   : > { %v398_v7 = vpop.xlane.xlu0 %397 }
 0x1e2   : > { %v399_v8 = vsub.f32 %v391_v4, %v398_v7 }
 0x1e4   : > { %v400_v9 = vmul.f32 1.442695, %v399_v8 }
 0x1e6   : > { %793 = vpow2.f32 %v400_v9 }
 0x1f0   : > { %v794_v10 = vpop.eup %793 }
 0x1f1   : > { %v402_v11 = vsel %vm395_vm2, %v794_v10, 0.0 }
 0x1f2   : > { %403 = vadd.xlane.f32.xlu0 %v402_v11 }
 0x27f   : > { %v404_v13 = vpop.xlane.xlu0 %403 }
 0x280   : > { %795 = vrcp.f32 %v404_v13 }
 0x28a   : > { %v796_v14 = vpop.eup %795 }
 0x28b   : > { %v406_v15 = vmul.f32 %v796_v14, %v404_v13 }
 0x28d   : > { %v407_v16 = vsub.f32 2.0, %v406_v15 }
 0x28f   : > { %v408_v17 = vmul.f32 %v796_v14, %v407_v16 }
 0x291   : > { %v409_v18 = vmul.f32 %v794_v10, %v408_v17 }
 0x293   : > { %712 = vmatmul.mubr.msk.f32.vlgmr.msra.gmra.mrb[0].mxu1 %vm395_vm2, %v409_v18  ;;  %484 = vst.msk [vmem:[%s313_s27] sm:$0xff] %vm395_vm2, %v409_v18 }
 0x294   : > { %900 = shalt.err (!%p897_p13)
}
 0x295   : > { %s901_s9 = scalar_lea.hbm %s1262_s11, 128  ;;  %s905_s19 = scalar_lea.hbm %s1342_s4, 256 }
 0x296   : > { %p902_p11 = scmp.ne.s32.totalorder %s1262_s11, %s901_s9  ;;  %p906_p7 = scmp.lt.u32.totalorder %s1262_s11, %s1342_s4 }
 0x297   : > { %p907_p3 = scmp.lt.u32.totalorder %s905_s19, %s901_s9  ;;  %p909_p4 = scmp.lt.u32.totalorder %s901_s9, %s1262_s11 }
 0x298   : > { %p903_p2 = pnand %p902_p11, %p1370_p10 }
 0x299   : > { %p908_p0 = por %p907_p3, %p906_p7 }
 0x29a   : > { %p904_p5 = pneg %p903_p2 }
 0x29b   : > { %p910_p12 = por %p909_p4, %p908_p0 }
 0x29d   : > { %p911_p1 = pnand %p910_p12, %p904_p5 }
 0x29f   : > { %914 = shalt.err (!%p911_p1)
}
 0x2a0   : > { %721 = dma.vmem_to_hbm [thread:$0]  (%p1370_p10), %s520_s13, 128, %s1262_s11, %s491_s26  }
 0x2a1   : > { %s306_s24 = scalar_lea.vmem [#allocation8], %s1234_s12  ;;  %s1288_s14 = scalar_lea.hbm %s1341_s3, %s696_s5 }
 0x2a2   : > { %s505_s21 = sshll.u32 %s306_s24, 4  ;;  %s486_s1 = scalar_lea.sflag [#allocation4], %s1231_s25  ;;  %s1290_s21 = int_to_ptr.vmem [resolvable:$true] %s505_s21 }
 0x2a3   : > { %s915_s7 = scalar_lea.vmem %s1290_s21, 128  ;;  %s1013_s18 = smov [#allocation8]  }
 0x2a4   : > { %p916_p8 = scmp.ne.s32.totalorder %s1290_s21, %s915_s7  ;;  %s919_s12 = sshll.u32 %s1013_s18, 4  ;;  %s920_s12 = int_to_ptr.vmem [resolvable:$false] %s919_s12 }
 0x2a5   : > { %s921_s5 = scalar_lea.vmem %s920_s12, 256  ;;  %p922_p13 = scmp.lt.s32.totalorder %s1290_s21, %s920_s12 }
 0x2a6   : > { %p917_p9 = pnand %p916_p8, %p1370_p10  ;;  %p923_p11 = scmp.lt.s32.totalorder %s921_s5, %s915_s7 }
 0x2a8   : > { %p918_p6 = pneg %p917_p9  ;;  %p924_p2 = por %p923_p11, %p922_p13 }
 0x2aa   : > { %p925_p5 = pnand %p924_p2, %p918_p6 }
 0x366   : > { %v479_v19 = vpop.f32.mrb[0].mxu1 }
 0x367   : > { %483 = vst.msk [vmem:[%s306_s24] sm:$0xff] %vm318_vm1, %v479_v19  ;;  %v713_v20 = vpop.f32.mrb[1].mxu1 }
 0x368   : > { %928 = shalt.err (!%p925_p5)
}
 0x369   : > { %s929_s25 = scalar_lea.hbm %s1288_s14, 128  ;;  %s933_s26 = scalar_lea.hbm %s1341_s3, 256 }
 0x36a   : > { %p930_p7 = scmp.ne.s32.totalorder %s1288_s14, %s929_s25  ;;  %p934_p4 = scmp.lt.u32.totalorder %s1288_s14, %s1341_s3 }
 0x36b   : > { %p935_p12 = scmp.lt.u32.totalorder %s933_s26, %s929_s25  ;;  %p937_p8 = scmp.lt.u32.totalorder %s929_s25, %s1288_s14 }
 0x36c   : > { %p931_p3 = pnand %p930_p7, %p1370_p10 }
 0x36d   : > { %p936_p1 = por %p935_p12, %p934_p4 }
 0x36e   : > { %p932_p0 = pneg %p931_p3 }
 0x36f   : > { %p938_p9 = por %p937_p8, %p936_p1 }
 0x371   : > { %p939_p6 = pnand %p938_p9, %p932_p0 }
 0x373   : > { %942 = shalt.err (!%p939_p6)
}
 0x374   : > { %720 = dma.vmem_to_hbm [thread:$0]  (%p1370_p10), %s1290_s21, 128, %s1288_s14, %s486_s1  }
 0x375 PF: > { %s1371_s9 = sld [smem:[#allocation16_spill]]  ;;  %s531_s10 = sand.u32 1, %s985_s15  }
 0x376   : > { %p1372_p13 = scmp.ne.s32.totalorder %s1359_s30, 0  ;;  %s532_s20 = scalar_lea.sflag [#allocation4], %s531_s10 }
 0x37b   : > { %p1373_p11 = scmp.ge.s32.totalorder %s1371_s9, 2 }
 0x37d   : > { %p735_p2 = pnand %p1373_p11, %p1372_p13 }
 0x37f   : > { %976 = dma.done.wait (!%p735_p2), %s532_s20, 128  }
 0x380   : > { %978 = vsyncadd (!%p735_p2), %s532_s20, 4294967168  ;;  %s541_s19 = scalar_lea.sflag [#allocation10], %s531_s10 }
 0x381   : > { %980 = dma.done.wait (!%p735_p2), %s541_s19, 128  }
 0x382   : > { %982 = vsyncadd (!%p735_p2), %s541_s19, 4294967168  ;;  %s27_s20 = sadd.s32 1, %s1371_s9   ;;  %s1374_s28 = sld [smem:[#allocation18_spill]] }
 0x383   : > { %p24_p5 = scmp.ge.s32.totalorder %s27_s20, 4   ;;  %s1375_s18 = sld [smem:[#allocation15_spill]] }
 0x384   : > { %s1376_s19 = sld [smem:[#allocation17_spill]]  ;;  %s1377_s15 = smov %s989_s16 }
 0x385   : > { %s1378_s16 = smov %s993_s17  ;;  %26 = sbr.rel (!%p24_p5) target bundleno = 12 (0xc), region = 118 }
 0x388   : > { %s1379_s17 = smov %s1374_s28 }
 0x38c   :  { %546 = vsyncpa [#allocation3], 1 }
 0x38d   :  { %548 = vsyncpa [#allocation3 + $0x1], 1 }
 0x38e   :  { %549 = vsyncpa [#allocation6], 1 }
 0x38f   :  { %551 = vsyncpa [#allocation6 + $0x1], 1 }
 0x390   :  { %552 = vsyncpa [#allocation4], 1 }
 0x391   :  { %554 = vsyncpa [#allocation4 + $0x1], 1 }
 0x392   :  { %555 = vsyncpa [#allocation10], 1 }
 0x393   :  { %557 = vsyncpa [#allocation10 + $0x1], 1 }

</bundles_post_ra>
